<compile_context>
chip_gen: v6e
topology: v6e:2x2x1
jax: 0.10.0
libtpu: 0.0.40
codegen_flags: <defaults>
</compile_context>

<pallas_src>
import jax
import jax.numpy as jnp
from jax.experimental import pallas as pl
from jax.experimental.pallas import tpu as pltpu


_TILE_BYTES = 4 << 20   # per-buffer tile budget; in+out double-buffered -> <=16 MiB
_VMEM_LIMIT = 32 << 20  # explicit scoped-VMEM limit, valid on v5e/v6e/v7x


def _identity_copy_kernel(x_ref, y_ref):
    # Identity pass-through: the elementwise "hot path" of the trivial
    # invertible module (its own inverse, so `rev` does not change it).
    y_ref[...] = x_ref[...]


def _sublane(dtype):
    # Sublane packing: 8 rows for 32-bit, 16 for 16-bit, 32 for 8-bit dtypes.
    itemsize = jnp.dtype(dtype).itemsize
    return 8 * max(1, 4 // max(itemsize, 1))


def _pad_to(n, m):
    return (n + m - 1) // m * m


def _largest_divisor_multiple(n, unit, cap):
    """Largest d <= cap with d % unit == 0 and n % d == 0 (requires n % unit == 0)."""
    d = min(n, (cap // unit) * unit)
    d = max(d, unit)
    while n % d != 0:
        d -= unit
    return d


def _pick_tiles(Bp, Fp, dtype):
    """Lane-dense, dtype-aware tiles targeting ~_TILE_BYTES per grid step."""
    itemsize = jnp.dtype(dtype).itemsize
    sub = _sublane(dtype)
    target_elems = max(_TILE_BYTES // itemsize, sub * 128)

    # Feature (lane) tile: large multiple of 128 dividing Fp.
    tf_cap = max(128, min(Fp, target_elems // sub))
    tf = _largest_divisor_multiple(Fp, 128, tf_cap)

    # Batch (sublane) tile: fill the remaining byte budget.
    tb_cap = max(sub, target_elems // tf)
    tb = _largest_divisor_multiple(Bp, sub, tb_cap)

    # Guarantee >=2 grid steps along a "parallel" axis whenever possible so
    # both v7x TensorCores get work (mem-bound copy ~halves with 2 TCs).
    if (Bp // tb) * (Fp // tf) == 1:
        if tf % 256 == 0:
            tf //= 2
        elif tb % (2 * sub) == 0:
            tb //= 2
    return tb, tf


def invertible_module_forward(x_nchw, c=None, rev=False, jac=True,
                              materialize=True):
    """Mirrors InvertibleModule.forward contract: ((out,), log_det_jac)."""
    B = x_nchw.shape[0]

    if not materialize:
        # Review item #1: for a pure identity, don't launch a kernel at all —
        # zero HBM traffic beats any copy-kernel roofline.
        ldj = jnp.zeros((B,), jnp.float32) if jac else None
        return (x_nchw,), ldj

    in_shape = x_nchw.shape
    F = 1
    for d in in_shape[1:]:
        F *= d
    x_flat = x_nchw.reshape(B, F)  # glue: layout flattening stays in plain JAX

    sub = _sublane(x_flat.dtype)
    Bp, Fp = _pad_to(B, sub), _pad_to(F, 128)
    padded = (Bp != B) or (Fp != F)
    if padded:
        # Bounded padding keeps the kernel lane-dense and VMEM-bounded on
        # unaligned shapes (instead of an unbounded full-extent block).
        x_flat = jnp.pad(x_flat, ((0, Bp - B), (0, Fp - F)))

    tb, tf = _pick_tiles(Bp, Fp, x_flat.dtype)

    out_flat = pl.pallas_call(
        _identity_copy_kernel,
        out_shape=jax.ShapeDtypeStruct((Bp, Fp), x_flat.dtype),
        grid=(Bp // tb, Fp // tf),
        in_specs=[pl.BlockSpec((tb, tf), lambda i, j: (i, j))],
        out_specs=pl.BlockSpec((tb, tf), lambda i, j: (i, j)),
        compiler_params=pltpu.CompilerParams(
            dimension_semantics=("parallel", "parallel"),
            vmem_limit_bytes=_VMEM_LIMIT),
    )(x_flat)

    if padded:
        out_flat = out_flat[:B, :F]
    out = out_flat.reshape(in_shape)

    if not jac:
        return (out,), None
    # Constant per-sample zero log|det J| — no kernel needed (a 1-wide kernel
    # output would force masked partial stores).
    log_det_jac = jnp.zeros((B,), jnp.float32)
    return (out,), log_det_jac


if __name__ == "__main__":
    key = jax.random.PRNGKey(0)
    B, C, H, W = 2, 4, 16, 16
    x = jax.random.normal(key, (B, C, H, W), dtype=jnp.float32)

    # Pallas streaming-copy template path.
    (out,), ldj = invertible_module_forward(x)
    out = jax.block_until_ready(out)
    ldj = jax.block_until_ready(ldj)
    assert out.shape == (B, C, H, W)
    assert out.dtype == x.dtype
    assert ldj.shape == (B,)
    assert bool(jnp.allclose(out, x))
    assert bool(jnp.allclose(ldj, jnp.zeros((B,), jnp.float32)))

    # rev / jac=False paths exercise the same contract.
    (out_rev,), none_jac = invertible_module_forward(x, rev=True, jac=False)
    out_rev = jax.block_until_ready(out_rev)
    assert none_jac is None
    assert bool(jnp.allclose(out_rev, x))

    # Zero-HBM-traffic identity path (kernel elided).
    (out_fast,), ldj_fast = invertible_module_forward(x, materialize=False)
    out_fast = jax.block_until_ready(out_fast)
    assert bool(jnp.allclose(out_fast, x))
    assert ldj_fast.shape == (B,)

    print("KERNEL_OK")
</pallas_src>

<mosaic_0001>
module attributes {stable_mosaic.version = 11 : i64} {
  func.func @_identity_copy_kernel(%arg0: i32, %arg1: i32, %arg2: memref<8x512xf32, #tpu.memory_space<vmem>>, %arg3: memref<8x512xf32, #tpu.memory_space<vmem>>) attributes {dimension_semantics = [#tpu.dimension_semantics<parallel>, #tpu.dimension_semantics<parallel>], iteration_bounds = array<i64: 1, 2>, scalar_prefetch = 0 : i64, scratch_operands = 0 : i64, tpu.core_type = #tpu.core_type<tc>, window_params = [{transform_indices = @transform_0, window_bounds = array<i64: 8, 512>}, {transform_indices = @transform_1, window_bounds = array<i64: 8, 512>}]} {
    %c0 = arith.constant 0 : index
    %c0_0 = arith.constant 0 : index
    %0 = vector.load %arg2[%c0, %c0_0] : memref<8x512xf32, #tpu.memory_space<vmem>>, vector<8x512xf32>
    %c0_1 = arith.constant 0 : index
    %c0_2 = arith.constant 0 : index
    %1 = vector.load %arg3[%c0_1, %c0_2] : memref<8x512xf32, #tpu.memory_space<vmem>>, vector<8x512xf32>
    tpu.vector_store %arg3[%c0_1, %c0_2], %0 {strides = array<i32>} : memref<8x512xf32, #tpu.memory_space<vmem>>, vector<8x512xf32>,
    return
  }
  func.func @transform_0(%arg0: i32, %arg1: i32) -> (i32, i32) {
    %c0_i32 = arith.constant 0 : i32
    return %arg0, %arg1 : i32, i32
  }
  func.func @transform_1(%arg0: i32, %arg1: i32) -> (i32, i32) {
    %c0_i32 = arith.constant 0 : i32
    return %arg0, %arg1 : i32, i32
  }
}

</mosaic_0001>

<bundles_post_ra>
// kernel: tpu_custom_call.1
= control target key start
LH: loop header
LB: loop body
LE: loop exit
PB: predicated region body
PF: predicated region fallthrough
CT: control target
= control target key end

     0   :  { %6 = vsyncpa [#allocation3], 0  ;;  %s609_s0 = inlined_call_operand.hbm [shape: f32[8,1024], index: 0, kind: input, shape index: {}]   ;;  %s610_s1 = inlined_call_operand.hbm [shape: f32[8,1024], index: 1, kind: output, shape index: {}]  }
   0x1   :  { %8 = vsyncpa [#allocation3 + $0x1], 0 }
   0x2   :  { %9 = vsyncpa [#allocation4], 0 }
   0x3   :  { %11 = vsyncpa [#allocation4 + $0x1], 0  ;;  %s463_s6 = smov 0   ;;  %s465_s7 = smov 0  }
   0x4   :  { %s467_s8 = smov 0   ;;  %s469_s9 = smov 0  }
   0x5   :  { %s471_s10 = smov 0   ;;  %s473_s11 = smov 0  }
   0x6 LB: > { %s262_s12 = sadd.s32 4294967295, %s449_s11   ;;  %s263_s13 = sadd.s32 4294967294, %s449_s11   ;;  %s449_s11 = sphi %s473_s11, %s17_s11   ;;  %s445_s10 = sphi %s471_s10, %s622_s10   ;;  %s441_s9 = sphi %s469_s9, %s621_s9   ;;  %s437_s8 = sphi %s467_s8, %s620_s8   ;;  %s433_s7 = sphi %s465_s7, %s619_s7   ;;  %s429_s6 = sphi %s463_s6, %s618_s6  }
   0x7   : > { %s26_s14 = sadd.s32 1, %s445_s10  ;;  %s38_s15 = sadd.s32 1, %s437_s8 }
   0x8   : > { %p27_p0 = scmp.ge.s32.totalorder %s26_s14, 2  ;;  %p45_p1 = scmp.ne.s32.totalorder %s437_s8, %s433_s7 }
   0x9   : > { %p46_p2 = scmp.eq.s32.totalorder %s449_s11, 0  ;;  %p51_p3 = scmp.ne.s32.totalorder %s433_s7, %s429_s6 }
   0xa   : > { %s624_s14 = smov (%p27_p0, %s26_s14), 0  ;;  %p52_p5 = scmp.eq.s32.totalorder %s262_s12, 0 }
   0xb   : > { %p504_p4 = por %p46_p2, %p45_p1  ;;  %s34_s17 = ssub.s32 %s445_s10, %s624_s14 }
   0xc   : > { %p77_p6 = scmp.eq.s32.totalorder %s262_s12, 1  ;;  %p36_p7 = scmp.eq.s32.totalorder %s34_s17, 0 }
   0xd   : > { %p510_p8 = por %p52_p5, %p51_p3  ;;  %p83_p10 = scmp.eq.s32.totalorder %s263_s13, 1 }
   0xe   : > { %p514_p9 = por %p77_p6, %p45_p1  ;;  %p291_p13 = scmp.lt.s32.totalorder %s449_s11, 2 }
   0xf   : > { %s519_s20 = scalar_select %p36_p7, %s437_s8, %s38_s15  }
  0x10   : > { %p521_p11 = por %p83_p10, %p51_p3  ;;  %s103_s22 = sand.u32 1, %s437_s8  }
  0x11   : > { %s266_s23 = sshll.u32 %s103_s22, 5  ;;  %s277_s24 = sshll.u32 %s445_s10, 9 }
  0x12   : > { %s614_s21 = scalar_select %p521_p11, 1, 0 }
  0x13   : > { %s115_s27 = scalar_lea.hbm %s609_s0, %s277_s24  ;;  %s107_s28 = scalar_lea.vmem [#allocation2], %s266_s23 }
  0x14   : > { %s117_s29 = sshll.u32 %s107_s28, 4  ;;  %p534_p0 = pnand %p291_p13, %p504_p4  ;;  %s118_s29 = int_to_ptr.vmem [resolvable:$true] %s117_s29 }
  0x15   : > { %p269_p1 = scmp.ge.s32.totalorder %s449_s11, 1  ;;  %p122_p2 = scmp.lt.s32.totalorder %s449_s11, 3 }
  0x16   : > { %s104_s2 = scalar_lea.sflag [#allocation3], %s103_s22  ;;  %p343_p3 = pneg %p534_p0 }
  0x17   : > { %s354_s3 = scalar_lea.vmem %s118_s29, 512  ;;  %s451_s4 = smov [#allocation2]  }
  0x18   : > { %p355_p5 = scmp.ne.s32.totalorder %s118_s29, %s354_s3  ;;  %s359_s5 = sshll.u32 %s451_s4, 4  ;;  %s360_s5 = int_to_ptr.vmem [resolvable:$false] %s359_s5 }
  0x19   : > { %s361_s12 = scalar_lea.vmem %s360_s5, 1024  ;;  %p362_p10 = scmp.lt.s32.totalorder %s118_s29, %s360_s5 }
  0x1a   : > { %p357_p6 = pnand %p355_p5, %p343_p3  ;;  %p363_p12 = scmp.lt.s32.totalorder %s361_s12, %s354_s3 }
  0x1c   : > { %p358_p7 = pneg %p357_p6  ;;  %p364_p4 = por %p363_p12, %p362_p10 }
  0x1e   : > { %p365_p13 = pnand %p364_p4, %p358_p7 }
  0x20   : > { %368 = shalt.err (!%p365_p13)
}
  0x21   : > { %286 = dma.hbm_to_vmem [thread:$0]  (!%p534_p0), %s115_s27, 512, %s118_s29, %s104_s2  }
  0x22   : > { %p123_p11 = pnand %p269_p1, %p122_p2 }
  0x23   : > { %s549_s13 = sand.u32 (!%p123_p11), 1, %s433_s7  }
  0x24   : > { %126 = sbr.rel (%p123_p11) target bundleno = 66 (0x42), region = 24  ;;  %s270_s15 = sshll.u32 (!%p123_p11), %s549_s13, 5 }
  0x25   : > { %s129_s16 = scalar_lea.sflag (!%p123_p11), [#allocation3], %s549_s13  ;;  %s132_s17 = scalar_lea.vmem (!%p123_p11), [#allocation2], %s270_s15 }
  0x29   : > { %420 = dma.done.wait (%p510_p8), %s129_s16, 512  }
  0x2a   : > { %422 = vsyncadd (%p510_p8), %s129_s16, 4294966784  ;;  %s150_s22 = scalar_lea.vmem [#allocation5], %s270_s15  ;;  %s278_s24 = sshll.u32 %s441_s9, 9  ;;  %v153_v0 = vld [vmem:[%s132_s17] sm:$0xff]  ;;  %v154_v1 = vld [vmem:[%s132_s17 + $0x8] sm:$0xff] }
  0x2b   : > { %s178_s23 = sshll.u32 %s150_s22, 4  ;;  %v155_v2 = vld [vmem:[%s132_s17 + $0x10] sm:$0xff]  ;;  %s563_s27 = scalar_lea.hbm %s610_s1, %s278_s24  ;;  %157 = vst [vmem:[%s150_s22] sm:$0xff] %v153_v0  ;;  %158 = vst [vmem:[%s150_s22 + $0x8] sm:$0xff] %v154_v1  ;;  %v156_v3 = vld [vmem:[%s132_s17 + $0x18] sm:$0xff]  ;;  %s558_s23 = int_to_ptr.vmem [resolvable:$true] %s178_s23 }
  0x2c   : > { %159 = vst [vmem:[%s150_s22 + $0x10] sm:$0xff] %v155_v2  ;;  %160 = vst [vmem:[%s150_s22 + $0x18] sm:$0xff] %v156_v3  ;;  %s162_s18 = scalar_lea.sflag [#allocation4], %s549_s13  ;;  %s369_s9 = scalar_lea.vmem %s558_s23, 512 }
  0x2d   : > { %p370_p8 = scmp.ne.s32.totalorder %s558_s23, %s369_s9  ;;  %s452_s28 = smov [#allocation5]  }
  0x2e   : > { %s373_s29 = sshll.u32 %s452_s28, 4  ;;  %s374_s29 = int_to_ptr.vmem [resolvable:$false] %s373_s29 }
  0x2f   : > { %p371_p11 = pnand %p370_p8, %p514_p9  ;;  %s375_s30 = scalar_lea.vmem %s374_s29, 1024 }
  0x30   : > { %p376_p0 = scmp.lt.s32.totalorder %s558_s23, %s374_s29  ;;  %p377_p1 = scmp.lt.s32.totalorder %s375_s30, %s369_s9 }
  0x31   : > { %p372_p12 = pneg %p371_p11 }
  0x32   : > { %p378_p2 = por %p377_p1, %p376_p0 }
  0x34   : > { %p379_p3 = pnand %p378_p2, %p372_p12 }
  0x36   : > { %382 = shalt.err (!%p379_p3)
}
  0x37   : > { %s383_s2 = scalar_lea.hbm %s563_s27, 512  ;;  %s387_s5 = scalar_lea.hbm %s610_s1, 1024 }
  0x38   : > { %p384_p5 = scmp.ne.s32.totalorder %s563_s27, %s383_s2  ;;  %p388_p10 = scmp.lt.s32.totalorder %s563_s27, %s610_s1 }
  0x39   : > { %p389_p4 = scmp.lt.s32.totalorder %s387_s5, %s383_s2 }
  0x3a   : > { %p385_p6 = pnand %p384_p5, %p514_p9 }
  0x3b   : > { %p390_p13 = por %p389_p4, %p388_p10 }
  0x3c   : > { %p386_p7 = pneg %p385_p6 }
  0x3e   : > { %p391_p8 = pnand %p390_p13, %p386_p7 }
  0x40   : > { %394 = shalt.err (!%p391_p8)
}
  0x41   : > { %281 = dma.vmem_to_hbm [thread:$0]  (%p514_p9), %s558_s23, 512, %s563_s27, %s162_s18  }
  0x42 PF: > { %s190_s15 = sand.u32 1, %s429_s6   ;;  %p616_p11 = scmp.ne.s32.totalorder %s614_s21, 0 }
  0x43   : > { %p617_p12 = scmp.ge.s32.totalorder %s449_s11, 2  ;;  %s191_s16 = scalar_lea.sflag [#allocation4], %s190_s15 }
  0x45   : > { %p288_p0 = pnand %p617_p12, %p616_p11 }
  0x47   : > { %p289_p1 = pneg %p288_p0 }
  0x49   : > { %424 = dma.done.wait (%p289_p1), %s191_s16, 512  }
  0x4a   : > { %426 = vsyncadd (%p289_p1), %s191_s16, 4294966784  ;;  %s17_s11 = sadd.s32 1, %s449_s11   ;;  %s618_s6 = smov %s433_s7 }
  0x4b   : > { %p14_p2 = scmp.ge.s32.totalorder %s17_s11, 4   ;;  %s619_s7 = smov %s437_s8 }
  0x4c   : > { %s620_s8 = smov %s519_s20  ;;  %s621_s9 = smov %s445_s10 }
  0x4d   : > { %s622_s10 = smov %s624_s14  ;;  %16 = sbr.rel (!%p14_p2) target bundleno = 6 (0x6), region = 69 }
  0x52   :  { %196 = vsyncpa [#allocation3], 1 }
  0x53   :  { %198 = vsyncpa [#allocation3 + $0x1], 1 }
  0x54   :  { %199 = vsyncpa [#allocation4], 1 }
  0x55   :  { %201 = vsyncpa [#allocation4 + $0x1], 1 }

</bundles_post_ra>
